<compile_context>
chip_gen: v6e
topology: v6e:2x2x1
jax: 0.10.0
libtpu: 0.0.40
codegen_flags: <defaults>
</compile_context>

<pallas_src>
import numpy as np
import jax
import jax.numpy as jnp
from jax import lax
from jax.experimental import pallas as pl
from jax.experimental.pallas import tpu as pltpu

# ----------------------------- configuration ------------------------------
B = 2             # batch
S = 8             # sequence length
HIDDEN = 32       # bert hidden size
NUM_HEADS = 4     # ner_num_heads (entity types)
HEAD_SIZE = 16    # ner_head_size (even)
VOCAB = 100
NEG_INF = -1e12
PROJ = NUM_HEADS * 2 * HEAD_SIZE      # 128 -> lane-dense projection width
BS = B * S                            # 16  -> whole batch in one block


def rope_constants():
    # exactly as in the PyTorch __init__ (note: no position dependence)
    idx = np.arange(0, HEAD_SIZE // 2, dtype=np.float32)
    freqs = np.power(np.float32(10000.0), -2.0 * idx / np.float32(HEAD_SIZE))
    cos_d = np.repeat(np.cos(freqs), 2).astype(np.float32)          # (D,)
    sin_d = np.repeat(np.sin(freqs), 2).astype(np.float32)          # (D,)
    trans_d = np.array([-1.0, 1.0] * (HEAD_SIZE // 2), np.float32)  # (D,)
    return cos_d, sin_d, trans_d


# --------------------------- fused Pallas kernel ---------------------------
def myner_kernel(emb_ref, wenc_ref, benc_ref, wd_ref, bd_ref, mask_ref, o_ref):
    """Fused synthetic-BERT encoder + GlobalPointer head, whole batch at once.

    emb_ref:  (B*S, HIDDEN)   embedded tokens (batch flattened into sublanes)
    wenc_ref: (HIDDEN, HIDDEN) encoder weight    benc_ref: (1, HIDDEN)
    wd_ref:   (HIDDEN, PROJ)  dense weight with rope scale (and 1/sqrt(D) on
                              the q-columns) folded in; bd_ref: (1, PROJ)
    mask_ref: (B*S, B*S)      additive mask bias, block-diagonal per batch
    o_ref:    (NUM_HEADS, B*S, B*S)  per-head scores; wrapper keeps the
                              per-batch diagonal SxS blocks
    """
    D = HEAD_SIZE

    # ---- synthetic encoder: tanh(x @ W_enc + b_enc) -----------------------
    x = emb_ref[...]                                                 # (BS, H)
    hid = jnp.tanh(
        jnp.dot(x, wenc_ref[...], preferred_element_type=jnp.float32)
        + benc_ref[...])                                             # (BS, H)

    # ---- dense projection (RoPE + score scale already folded in) ----------
    proj = jnp.dot(hid, wd_ref[...], preferred_element_type=jnp.float32)
    proj = proj + bd_ref[...]                                        # (BS, PROJ)

    mask = mask_ref[...]                                             # (BS, BS)

    # ---- per-head scores: static lane slices, one MXU pass per head -------
    # (no head-major reshape/transpose; cross-batch blocks are discarded in
    #  the wrapper, which is far cheaper than an in-kernel relayout)
    for h in range(NUM_HEADS):                                       # static unroll
        base = h * 2 * D
        q_h = proj[:, base: base + D]                                # (BS, D)
        v_h = proj[:, base + D: base + 2 * D]                        # (BS, D)
        s_h = lax.dot_general(q_h, v_h, (((1,), (1,)), ((), ())),
                              preferred_element_type=jnp.float32)    # (BS, BS)
        o_ref[h] = s_h + mask


# ------------------------------ wrapper ------------------------------------
def myner_forward(emb, attention_mask, w_enc, b_enc, w_dense, b_dense):
    """emb: (B,S,HIDDEN), attention_mask: (B,S) -> scores (B,NUM_HEADS,S,S)."""
    D = HEAD_SIZE

    # fold RoPE (position independent -> exact per-column scale) and
    # 1/sqrt(D) (q columns only) into the dense weight/bias
    cos_d, sin_d, trans_d = rope_constants()
    rope_scale = cos_d + trans_d * sin_d                             # (D,)
    inv_sqrt = np.float32(1.0 / np.sqrt(D))
    col = np.empty((PROJ,), np.float32)
    for h in range(NUM_HEADS):
        base = h * 2 * D
        col[base: base + D] = rope_scale * inv_sqrt                  # q cols
        col[base + D: base + 2 * D] = rope_scale                     # v cols
    col = jnp.asarray(col)[None, :]                                  # (1, PROJ)
    wd = w_dense * col
    bd = b_dense * col

    # additive mask bias, precomputed and embedded block-diagonally
    am = attention_mask.astype(jnp.float32)                          # (B, S)
    upper = jnp.asarray(1.0 - np.tril(np.ones((S, S), np.float32)))  # (S, S)
    m = jnp.maximum(am[:, None, :] + upper[None, :, :] - 1.0, 0.0)   # (B, S, S)
    bias = (1.0 - m) * NEG_INF                                       # (B, S, S)
    mask_big = jnp.zeros((BS, BS), jnp.float32)
    for b in range(B):
        mask_big = mask_big.at[b * S:(b + 1) * S, b * S:(b + 1) * S].set(bias[b])

    emb2d = emb.reshape(BS, HIDDEN)

    out = pl.pallas_call(
        myner_kernel,
        out_shape=jax.ShapeDtypeStruct((NUM_HEADS, BS, BS), jnp.float32),
        grid_spec=pltpu.PrefetchScalarGridSpec(
            num_scalar_prefetch=0,
            grid=(1,),                                   # single collapsed step
            in_specs=[
                pl.BlockSpec((BS, HIDDEN), lambda i: (0, 0)),        # emb
                pl.BlockSpec((HIDDEN, HIDDEN), lambda i: (0, 0)),    # w_enc
                pl.BlockSpec((1, HIDDEN), lambda i: (0, 0)),         # b_enc
                pl.BlockSpec((HIDDEN, PROJ), lambda i: (0, 0)),      # w_dense
                pl.BlockSpec((1, PROJ), lambda i: (0, 0)),           # b_dense
                pl.BlockSpec((BS, BS), lambda i: (0, 0)),            # mask bias
            ],
            out_specs=pl.BlockSpec((NUM_HEADS, BS, BS), lambda i: (0, 0, 0)),
        ),
    )(emb2d, w_enc, b_enc, wd, bd, mask_big)

    # keep only the per-batch diagonal SxS blocks -> (B, NH, S, S)
    # (layout plumbing outside the kernel; fused by XLA into copy-out)
    scores = jnp.stack(
        [out[:, b * S:(b + 1) * S, b * S:(b + 1) * S] for b in range(B)],
        axis=0)
    return scores


# ------------------------- pure-JAX reference ------------------------------
def myner_ref(emb, attention_mask, w_enc, b_enc, w_dense, b_dense):
    D = HEAD_SIZE
    cos_d, sin_d, trans_d = rope_constants()
    cos_d = jnp.asarray(cos_d)
    sin_d = jnp.asarray(sin_d)
    trans_d = jnp.asarray(trans_d)

    hidden = jnp.tanh(emb @ w_enc + b_enc)                           # (B,S,H)
    proj = hidden @ w_dense + b_dense                                # (B,S,PROJ)
    proj = proj.reshape(B, S, NUM_HEADS, 2 * D).transpose(0, 2, 1, 3)
    q, v = proj[..., :D], proj[..., D:]
    q = q * cos_d + q * trans_d * sin_d
    v = v * cos_d + v * trans_d * sin_d
    scores = jnp.einsum("bhqd,bhkd->bhqk", q, v) / np.sqrt(D)

    am = attention_mask[:, None, None, :]
    upper = jnp.asarray(1.0 - np.tril(np.ones((S, S), np.float32)))
    m = jnp.maximum(am + upper - 1.0, 0.0)       # (torch.clamp(min=0) equivalent)
    return scores + (1.0 - m) * NEG_INF


# --------------------------------- main ------------------------------------
if __name__ == "__main__":
    key = jax.random.PRNGKey(0)
    k_emb, k_wenc, k_benc, k_wd, k_bd, k_ids = jax.random.split(key, 6)

    # deterministic parameters
    emb_table = jax.random.normal(k_emb, (VOCAB, HIDDEN), jnp.float32) * 0.02
    w_enc = jax.random.normal(k_wenc, (HIDDEN, HIDDEN), jnp.float32) * 0.02
    b_enc = jax.random.normal(k_benc, (1, HIDDEN), jnp.float32) * 0.02
    w_dense = jax.random.normal(k_wd, (HIDDEN, PROJ), jnp.float32) * 0.02
    b_dense = jax.random.normal(k_bd, (1, PROJ), jnp.float32) * 0.02

    # example inputs
    input_ids = jax.random.randint(k_ids, (B, S), 0, VOCAB, jnp.int32)
    attention_mask = jnp.asarray(
        [[1, 1, 1, 1, 1, 1, 1, 1],
         [1, 1, 1, 1, 1, 0, 0, 0]], jnp.float32)                     # (B, S)

    # embedding lookup stays in the JAX wrapper (gather glue for the synthetic encoder)
    emb = jnp.take(emb_table, input_ids, axis=0)                     # (B,S,HIDDEN)

    scores = myner_forward(emb, attention_mask, w_enc, b_enc, w_dense, b_dense)
    scores = jax.block_until_ready(scores)

    ref = myner_ref(emb, attention_mask, w_enc, b_enc, w_dense, b_dense)
    np.testing.assert_allclose(np.asarray(scores), np.asarray(ref),
                               rtol=1e-5, atol=1e-5)
    assert scores.shape == (B, NUM_HEADS, S, S)
    print("KERNEL_OK")
</pallas_src>

<mosaic_0001>
module attributes {stable_mosaic.version = 11 : i64} {
  func.func @myner_kernel(%arg0: i32, %arg1: memref<16x32xf32, #tpu.memory_space<vmem>>, %arg2: memref<32x32xf32, #tpu.memory_space<vmem>>, %arg3: memref<1x32xf32, #tpu.memory_space<vmem>>, %arg4: memref<32x128xf32, #tpu.memory_space<vmem>>, %arg5: memref<1x128xf32, #tpu.memory_space<vmem>>, %arg6: memref<16x16xf32, #tpu.memory_space<vmem>>, %arg7: memref<4x16x16xf32, #tpu.memory_space<vmem>>) attributes {dimension_semantics = [#tpu.dimension_semantics<arbitrary>], iteration_bounds = array<i64: 1>, scalar_prefetch = 0 : i64, scratch_operands = 0 : i64, tpu.core_type = #tpu.core_type<tc>, window_params = [{pipeline_mode = #tpu.pipeline_mode<synchronous>, transform_indices = @transform_0, window_bounds = array<i64: 16, 32>}, {pipeline_mode = #tpu.pipeline_mode<synchronous>, transform_indices = @transform_1, window_bounds = array<i64: 32, 32>}, {pipeline_mode = #tpu.pipeline_mode<synchronous>, transform_indices = @transform_2, window_bounds = array<i64: 1, 32>}, {pipeline_mode = #tpu.pipeline_mode<synchronous>, transform_indices = @transform_3, window_bounds = array<i64: 32, 128>}, {pipeline_mode = #tpu.pipeline_mode<synchronous>, transform_indices = @transform_4, window_bounds = array<i64: 1, 128>}, {pipeline_mode = #tpu.pipeline_mode<synchronous>, transform_indices = @transform_5, window_bounds = array<i64: 16, 16>}, {pipeline_mode = #tpu.pipeline_mode<synchronous>, transform_indices = @transform_6, window_bounds = array<i64: 4, 16, 16>}]} {
    %c0 = arith.constant 0 : index
    %c0_0 = arith.constant 0 : index
    %0 = vector.load %arg1[%c0, %c0_0] : memref<16x32xf32, #tpu.memory_space<vmem>>, vector<16x32xf32>
    %c0_1 = arith.constant 0 : index
    %c0_2 = arith.constant 0 : index
    %1 = vector.load %arg2[%c0_1, %c0_2] : memref<32x32xf32, #tpu.memory_space<vmem>>, vector<32x32xf32>
    %cst = arith.constant dense<0.000000e+00> : vector<16x32xf32>
    %2 = tpu.matmul %0, %1, %cst {dimension_numbers = #tpu.dot_dimension_numbers<[1], [0], [0], [1], [0, 0, 1, 1], [], []>} : vector<16x32xf32>, vector<32x32xf32>, vector<16x32xf32> -> vector<16x32xf32>
    %c0_3 = arith.constant 0 : index
    %c0_4 = arith.constant 0 : index
    %3 = vector.load %arg3[%c0_3, %c0_4] : memref<1x32xf32, #tpu.memory_space<vmem>>, vector<1x32xf32>
    %4 = vector.broadcast %3 : vector<1x32xf32> to vector<16x32xf32>
    %5 = arith.addf %2, %4 : vector<16x32xf32>
    %6 = math.tanh %5 : vector<16x32xf32>
    %c0_5 = arith.constant 0 : index
    %c0_6 = arith.constant 0 : index
    %7 = vector.load %arg4[%c0_5, %c0_6] : memref<32x128xf32, #tpu.memory_space<vmem>>, vector<32x128xf32>
    %cst_7 = arith.constant dense<0.000000e+00> : vector<16x128xf32>
    %8 = tpu.matmul %6, %7, %cst_7 {dimension_numbers = #tpu.dot_dimension_numbers<[1], [0], [0], [1], [0, 0, 1, 1], [], []>} : vector<16x32xf32>, vector<32x128xf32>, vector<16x128xf32> -> vector<16x128xf32>
    %c0_8 = arith.constant 0 : index
    %c0_9 = arith.constant 0 : index
    %9 = vector.load %arg5[%c0_8, %c0_9] : memref<1x128xf32, #tpu.memory_space<vmem>>, vector<1x128xf32>
    %10 = vector.broadcast %9 : vector<1x128xf32> to vector<16x128xf32>
    %11 = arith.addf %8, %10 : vector<16x128xf32>
    %c0_10 = arith.constant 0 : index
    %c0_11 = arith.constant 0 : index
    %12 = vector.load %arg6[%c0_10, %c0_11] : memref<16x16xf32, #tpu.memory_space<vmem>>, vector<16x16xf32>
    %13 = vector.extract_strided_slice %11 {offsets = [0, 0], sizes = [16, 16], strides = [1, 1]} : vector<16x128xf32> to vector<16x16xf32>
    %14 = vector.extract_strided_slice %11 {offsets = [0, 16], sizes = [16, 16], strides = [1, 1]} : vector<16x128xf32> to vector<16x16xf32>
    %cst_12 = arith.constant dense<0.000000e+00> : vector<16x16xf32>
    %15 = tpu.matmul %13, %14, %cst_12 {dimension_numbers = #tpu.dot_dimension_numbers<[1], [1], [0], [0], [0, 0, 1, 0], [], []>} : vector<16x16xf32>, vector<16x16xf32>, vector<16x16xf32> -> vector<16x16xf32>
    %16 = arith.addf %15, %12 : vector<16x16xf32>
    %c0_13 = arith.constant 0 : index
    %c0_14 = arith.constant 0 : index
    %c0_15 = arith.constant 0 : index
    %17 = vector.load %arg7[%c0_13, %c0_14, %c0_15] : memref<4x16x16xf32, #tpu.memory_space<vmem>>, vector<1x16x16xf32>
    %18 = vector.shape_cast %17 : vector<1x16x16xf32> to vector<16x16xf32>
    %19 = vector.shape_cast %16 : vector<16x16xf32> to vector<1x16x16xf32>
    tpu.vector_store %arg7[%c0_13, %c0_14, %c0_15], %19 {strides = array<i32>} : memref<4x16x16xf32, #tpu.memory_space<vmem>>, vector<1x16x16xf32>,
    %20 = vector.extract_strided_slice %11 {offsets = [0, 32], sizes = [16, 16], strides = [1, 1]} : vector<16x128xf32> to vector<16x16xf32>
    %21 = vector.extract_strided_slice %11 {offsets = [0, 48], sizes = [16, 16], strides = [1, 1]} : vector<16x128xf32> to vector<16x16xf32>
    %cst_16 = arith.constant dense<0.000000e+00> : vector<16x16xf32>
    %22 = tpu.matmul %20, %21, %cst_16 {dimension_numbers = #tpu.dot_dimension_numbers<[1], [1], [0], [0], [0, 0, 1, 0], [], []>} : vector<16x16xf32>, vector<16x16xf32>, vector<16x16xf32> -> vector<16x16xf32>
    %23 = arith.addf %22, %12 : vector<16x16xf32>
    %c1 = arith.constant 1 : index
    %c0_17 = arith.constant 0 : index
    %c0_18 = arith.constant 0 : index
    %24 = vector.load %arg7[%c1, %c0_17, %c0_18] : memref<4x16x16xf32, #tpu.memory_space<vmem>>, vector<1x16x16xf32>
    %25 = vector.shape_cast %24 : vector<1x16x16xf32> to vector<16x16xf32>
    %26 = vector.shape_cast %23 : vector<16x16xf32> to vector<1x16x16xf32>
    tpu.vector_store %arg7[%c1, %c0_17, %c0_18], %26 {strides = array<i32>} : memref<4x16x16xf32, #tpu.memory_space<vmem>>, vector<1x16x16xf32>,
    %27 = vector.extract_strided_slice %11 {offsets = [0, 64], sizes = [16, 16], strides = [1, 1]} : vector<16x128xf32> to vector<16x16xf32>
    %28 = vector.extract_strided_slice %11 {offsets = [0, 80], sizes = [16, 16], strides = [1, 1]} : vector<16x128xf32> to vector<16x16xf32>
    %cst_19 = arith.constant dense<0.000000e+00> : vector<16x16xf32>
    %29 = tpu.matmul %27, %28, %cst_19 {dimension_numbers = #tpu.dot_dimension_numbers<[1], [1], [0], [0], [0, 0, 1, 0], [], []>} : vector<16x16xf32>, vector<16x16xf32>, vector<16x16xf32> -> vector<16x16xf32>
    %30 = arith.addf %29, %12 : vector<16x16xf32>
    %c2 = arith.constant 2 : index
    %c0_20 = arith.constant 0 : index
    %c0_21 = arith.constant 0 : index
    %31 = vector.load %arg7[%c2, %c0_20, %c0_21] : memref<4x16x16xf32, #tpu.memory_space<vmem>>, vector<1x16x16xf32>
    %32 = vector.shape_cast %31 : vector<1x16x16xf32> to vector<16x16xf32>
    %33 = vector.shape_cast %30 : vector<16x16xf32> to vector<1x16x16xf32>
    tpu.vector_store %arg7[%c2, %c0_20, %c0_21], %33 {strides = array<i32>} : memref<4x16x16xf32, #tpu.memory_space<vmem>>, vector<1x16x16xf32>,
    %34 = vector.extract_strided_slice %11 {offsets = [0, 96], sizes = [16, 16], strides = [1, 1]} : vector<16x128xf32> to vector<16x16xf32>
    %35 = vector.extract_strided_slice %11 {offsets = [0, 112], sizes = [16, 16], strides = [1, 1]} : vector<16x128xf32> to vector<16x16xf32>
    %cst_22 = arith.constant dense<0.000000e+00> : vector<16x16xf32>
    %36 = tpu.matmul %34, %35, %cst_22 {dimension_numbers = #tpu.dot_dimension_numbers<[1], [1], [0], [0], [0, 0, 1, 0], [], []>} : vector<16x16xf32>, vector<16x16xf32>, vector<16x16xf32> -> vector<16x16xf32>
    %37 = arith.addf %36, %12 : vector<16x16xf32>
    %c3 = arith.constant 3 : index
    %c0_23 = arith.constant 0 : index
    %c0_24 = arith.constant 0 : index
    %38 = vector.load %arg7[%c3, %c0_23, %c0_24] : memref<4x16x16xf32, #tpu.memory_space<vmem>>, vector<1x16x16xf32>
    %39 = vector.shape_cast %38 : vector<1x16x16xf32> to vector<16x16xf32>
    %40 = vector.shape_cast %37 : vector<16x16xf32> to vector<1x16x16xf32>
    tpu.vector_store %arg7[%c3, %c0_23, %c0_24], %40 {strides = array<i32>} : memref<4x16x16xf32, #tpu.memory_space<vmem>>, vector<1x16x16xf32>,
    return
  }
  func.func @transform_0(%arg0: i32) -> (i32, i32) {
    %c0_i32 = arith.constant 0 : i32
    %c0_i32_0 = arith.constant 0 : i32
    %c0_i32_1 = arith.constant 0 : i32
    return %c0_i32, %c0_i32_0 : i32, i32
  }
  func.func @transform_1(%arg0: i32) -> (i32, i32) {
    %c0_i32 = arith.constant 0 : i32
    %c0_i32_0 = arith.constant 0 : i32
    %c0_i32_1 = arith.constant 0 : i32
    return %c0_i32, %c0_i32_0 : i32, i32
  }
  func.func @transform_2(%arg0: i32) -> (i32, i32) {
    %c0_i32 = arith.constant 0 : i32
    %c0_i32_0 = arith.constant 0 : i32
    %c0_i32_1 = arith.constant 0 : i32
    return %c0_i32, %c0_i32_0 : i32, i32
  }
  func.func @transform_3(%arg0: i32) -> (i32, i32) {
    %c0_i32 = arith.constant 0 : i32
    %c0_i32_0 = arith.constant 0 : i32
    %c0_i32_1 = arith.constant 0 : i32
    return %c0_i32, %c0_i32_0 : i32, i32
  }
  func.func @transform_4(%arg0: i32) -> (i32, i32) {
    %c0_i32 = arith.constant 0 : i32
    %c0_i32_0 = arith.constant 0 : i32
    %c0_i32_1 = arith.constant 0 : i32
    return %c0_i32, %c0_i32_0 : i32, i32
  }
  func.func @transform_5(%arg0: i32) -> (i32, i32) {
    %c0_i32 = arith.constant 0 : i32
    %c0_i32_0 = arith.constant 0 : i32
    %c0_i32_1 = arith.constant 0 : i32
    return %c0_i32, %c0_i32_0 : i32, i32
  }
  func.func @transform_6(%arg0: i32) -> (i32, i32, i32) {
    %c0_i32 = arith.constant 0 : i32
    %c0_i32_0 = arith.constant 0 : i32
    %c0_i32_1 = arith.constant 0 : i32
    %c0_i32_2 = arith.constant 0 : i32
    return %c0_i32, %c0_i32_0, %c0_i32_1 : i32, i32, i32
  }
}

</mosaic_0001>

<bundles_post_ra>
// kernel: tpu_custom_call.1
= control target key start
LH: loop header
LB: loop body
LE: loop exit
PB: predicated region body
PF: predicated region fallthrough
CT: control target
= control target key end

     0   :  { %11 = vsyncpa [#allocation3], 0  ;;  %s1010_s0 = inlined_call_operand.hbm [shape: f32[16,32], index: 0, kind: input, shape index: {}]   ;;  %s1011_s1 = inlined_call_operand.hbm [shape: f32[32,32], index: 1, kind: input, shape index: {}]   ;;  %s1012_s2 = inlined_call_operand.vmem [shape: f32[1,32], index: 2, kind: input, shape index: {}]   ;;  %s1013_s3 = inlined_call_operand.hbm [shape: f32[32,128], index: 3, kind: input, shape index: {}]   ;;  %s1014_s4 = inlined_call_operand.vmem [shape: f32[1,128], index: 4, kind: input, shape index: {}]   ;;  %s1015_s5 = inlined_call_operand.hbm [shape: f32[16,16], index: 5, kind: input, shape index: {}]   ;;  %s1016_s6 = inlined_call_operand.hbm [shape: f32[4,16,16], index: 6, kind: output, shape index: {}]  }
   0x1   :  { %12 = vsyncpa [#allocation6], 0 }
   0x2   :  { %13 = vsyncpa [#allocation9], 0 }
   0x3   :  { %14 = vsyncpa [#allocation4], 0  ;;  %s889_s21 = smov [#allocation5]   ;;  %s890_s23 = smov [#allocation2]  }
   0x4   :  { %s32_s22 = sshll.u32 %s889_s21, 4  ;;  %s20_s24 = sshll.u32 %s890_s23, 4  ;;  %s33_s22 = int_to_ptr.vmem [resolvable:$true] %s32_s22  ;;  %s21_s24 = int_to_ptr.vmem [resolvable:$true] %s20_s24 }
   0x5   :  { %s789_s25 = scalar_lea.vmem %s33_s22, 512  ;;  %p794_p1 = scmp.lt.s32.totalorder %s33_s22, %s33_s22 }
   0x6   :  { %p790_p0 = scmp.ne.s32.totalorder %s33_s22, %s789_s25  ;;  %p795_p2 = scmp.lt.s32.totalorder %s789_s25, %s789_s25 }
   0x8   :  { %p796_p3 = por %p795_p2, %p794_p1 }
   0xa   :  { %p797_p4 = pnand %p796_p3, %p790_p0 }
   0xc   :  { %800 = shalt.err (!%p797_p4)
}
   0xd   :  { %s891_s26 = smov 128   ;;  %s892_s27 = smov 8  }
   0xe   :  { %38 = dma.hbm_to_vmem [thread:$0]  %s1011_s1, 512, %s33_s22, [#allocation6], %s891_s26, %s891_s26, %s892_s27  }
   0xf   :  { %s809_s30 = scalar_lea.vmem %s21_s24, 256  ;;  %p814_p6 = scmp.lt.s32.totalorder %s21_s24, %s21_s24 }
  0x10   :  { %p810_p5 = scmp.ne.s32.totalorder %s21_s24, %s809_s30  ;;  %p815_p7 = scmp.lt.s32.totalorder %s809_s30, %s809_s30 }
  0x12   :  { %p816_p8 = por %p815_p7, %p814_p6 }
  0x14   :  { %p817_p9 = pnand %p816_p8, %p810_p5 }
  0x16   :  { %820 = shalt.err (!%p817_p9)
}
  0x17   :  { %26 = dma.hbm_to_vmem [thread:$0]  %s1010_s0, 256, %s21_s24, [#allocation3], %s891_s26, %s891_s26, %s892_s27  }
  0x18   :  { %s893_s9 = smov [#allocation7]   ;;  %s894_s11 = smov [#allocation8]  }
  0x19   :  { %s46_s10 = sshll.u32 %s893_s9, 4  ;;  %s60_s12 = sshll.u32 %s894_s11, 4  ;;  %s47_s10 = int_to_ptr.vmem [resolvable:$true] %s46_s10  ;;  %s61_s12 = int_to_ptr.vmem [resolvable:$true] %s60_s12 }
  0x1a   :  { %s829_s1 = scalar_lea.vmem %s47_s10, 512  ;;  %p834_p11 = scmp.lt.s32.totalorder %s47_s10, %s47_s10 }
  0x1b   :  { %p830_p10 = scmp.ne.s32.totalorder %s47_s10, %s829_s1  ;;  %p835_p12 = scmp.lt.s32.totalorder %s829_s1, %s829_s1 }
  0x1d   :  { %p836_p13 = por %p835_p12, %p834_p11 }
  0x1f   :  { %p837_p0 = pnand %p836_p13, %p830_p10 }
  0x21   :  { %840 = shalt.err (!%p837_p0)
}
  0x22   :  { %52 = dma.hbm_to_vmem [thread:$0]  %s1013_s3, 512, %s47_s10, [#allocation6], %s891_s26, %s891_s26, %s892_s27  }
  0x23   :  { %s849_s0 = scalar_lea.vmem %s61_s12, 256  ;;  %p854_p2 = scmp.lt.s32.totalorder %s61_s12, %s61_s12 }
  0x24   :  { %p850_p1 = scmp.ne.s32.totalorder %s61_s12, %s849_s0  ;;  %p855_p3 = scmp.lt.s32.totalorder %s849_s0, %s849_s0 }
  0x26   :  { %p856_p4 = por %p855_p3, %p854_p2 }
  0x28   :  { %p857_p5 = pnand %p856_p4, %p850_p1 }
  0x2a   :  { %860 = shalt.err (!%p857_p5)
}
  0x2b   :  { %66 = dma.hbm_to_vmem [thread:$0]  %s1015_s5, 256, %s61_s12, [#allocation9], %s891_s26, %s891_s26, %s892_s27  }
  0x2c   :  { %881 = dma.done.wait [#allocation3], 256  }
  0x2d   :  { %882 = vsyncadd [#allocation3], 4294967040 }
  0x2e   :  { %883 = dma.done.wait [#allocation6], 1024  }
  0x2f   :  { %884 = vsyncadd [#allocation6], 4294966272 }
  0x30   :  { %885 = dma.done.wait [#allocation9], 256  }
  0x31   :  { %886 = vsyncadd [#allocation9], 4294967040  ;;  %vm92_vm0 = vcmask 261120   ;;  %v84_v0 = vld [vmem:[#allocation5 + $0x18] sm:$0xff]  ;;  %v83_v1 = vld [vmem:[#allocation5 + $0x10] sm:$0xff]  ;;  %vm276_vm1 = vcmask 130048  }
  0x32   :  { %713 = vmatprep.subr.mxu0 %v84_v0  ;;  %v79_v2 = vld [vmem:[#allocation2] sm:$0xff]  ;;  %v82_v3 = vld [vmem:[#allocation5 + $0x8] sm:$0xff]  ;;  %v81_v4 = vld [vmem:[#allocation5] sm:$0xff]  ;;  %s896_s19 = smov 112   ;;  %s897_s20 = smov 96  }
  0x33   :  { %714 = vmatpush3.msra.mxu0 %v84_v0  ;;  %721 = vmatprep.mubr.msk.f32.mxu0 %vm92_vm0, %v79_v2  ;;  %v80_v5 = vld [vmem:[#allocation2 + $0x8] sm:$0xff]  ;;  %v178_v7 = vld [vmem:[#allocation7 + $0x10] sm:$0xff]  ;;  %v177_v8 = vld [vmem:[#allocation7 + $0x8] sm:$0xff]  ;;  %s898_s21 = smov 80   ;;  %s899_s22 = smov 16  }
  0x34   :  { %715 = vmatprep.subr.mxu0 %v83_v1  ;;  %v179_v6 = vld [vmem:[#allocation7 + $0x18] sm:$0xff]  ;;  %v176_v9 = vld [vmem:[#allocation7] sm:$0xff]  ;;  %v663_v10 = vld [vmem:[%s1012_s2] ss:$0 sm:$0xff]  ;;  %s895_s2 = smov 48   ;;  %s901_s23 = smov 32  }
  0x35   :  { %716 = vmatpush3.msra.mxu0 %v83_v1  ;;  %724 = vmatprep.subr.mxu1 %v179_v6  ;;  %v666_v17 = vld [vmem:[%s1014_s4] ss:$0 sm:$0xff]  ;;  %s900_s4 = smov 64   ;;  %v269_v36 = vld [vmem:[#allocation8 + $0x8] sm:$0xff]  ;;  %v268_v38 = vld [vmem:[#allocation8] sm:$0xff]  ;;  %s902_s24 = smov [#allocation10]  }
  0x36   :  { %717 = vmatprep.subr.mxu0 %v82_v3  ;;  %725 = vmatpush3.msra.mxu1 %v179_v6  ;;  %s649_s25 = sshll.u32 %s902_s24, 4  ;;  %s650_s25 = int_to_ptr.vmem [resolvable:$true] %s649_s25 }
  0x37   :  { %718 = vmatpush3.msra.mxu0 %v82_v3  ;;  %726 = vmatprep.subr.mxu1 %v178_v7  ;;  %s861_s28 = scalar_lea.vmem %s650_s25, 1024  ;;  %p866_p7 = scmp.lt.s32.totalorder %s650_s25, %s650_s25 }
  0x38   :  { %719 = vmatprep.subr.mxu0 %v81_v4  ;;  %727 = vmatpush3.msra.mxu1 %v178_v7  ;;  %p862_p6 = scmp.ne.s32.totalorder %s650_s25, %s861_s28  ;;  %p867_p8 = scmp.lt.s32.totalorder %s861_s28, %s861_s28 }
  0x39   :  { %720 = vmatpush3.msra.mxu0 %v81_v4  ;;  %728 = vmatprep.subr.mxu1 %v177_v8 }
  0x3a   :  { %722 = vmatmul.mubr.msk.f32.vlgmr.msra.gmra.mxu0 %vm92_vm0, %v80_v5  ;;  %729 = vmatpush3.msra.mxu1 %v177_v8  ;;  %p868_p9 = por %p867_p8, %p866_p7 }
  0x3b   :  { %730 = vmatprep.subr.mxu1 %v176_v9 }
  0x3c   :  { %731 = vmatpush3.msra.mxu1 %v176_v9  ;;  %p869_p10 = pnand %p868_p9, %p862_p6 }
  0xfa   :  { %v723_v11 = vpop.f32.mrf.mxu0 }
  0xfb   :  { %v171_v12 = vadd.f32 %v723_v11, %v663_v10 }
  0xfc   :  { %v165_v13 = vpop.f32.mrf.mxu0 }
  0xfd   :  { %v166_v14 = vadd.f32 %v663_v10, %v165_v13 }
  0xff   :  { %777 = vtanh.f32 %v166_v14 }
 0x100   :  { %779 = vtanh.f32 %v171_v12 }
 0x10c   :  { %v778_v15 = vpop.eup %777 }
 0x10d   :  { %v780_v16 = vpop.eup %779  ;;  %732 = vmatprep.mubr.msk.f32.mxu1 %vm92_vm0, %v778_v15 }
 0x10e   :  { %733 = vmatmul.mubr.msk.f32.vlgmr.msra.gmra.mxu1 %vm92_vm0, %v780_v16 }
 0x1ce   :  { %v734_v18 = vpop.f32.mrf.mxu1 }
 0x1cf   :  { %v265_v19 = vadd.f32 %v734_v18, %v666_v17 }
 0x1d0   :  { %v259_v20 = vpop.f32.mrf.mxu1 }
 0x1d1   :  { %v260_v21 = vadd.f32 %v666_v17, %v259_v20  ;;  %462 = vrot.lane.b32.xlu1 %v265_v19, %s895_s2  ;;  %274 = vrot.lane.b32.xlu0 %v265_v19, %s896_s19 }
 0x1d3   :  { %739 = vmatprep.mubr.msk.f32.mxu0 %vm276_vm1, %v260_v21 }
 0x1d5   :  { %364 = vrot.lane.b32.xlu1 %v265_v19, %s897_s20  ;;  %368 = vrot.lane.b32.xlu0 %v265_v19, %s898_s21 }
 0x1d9   :  { %556 = vrot.lane.b32.xlu0 %v265_v19, %s899_s22  ;;  %272 = vrot.lane.b32.xlu1 %v260_v21, %s896_s19 }
 0x1dd   :  { %362 = vrot.lane.b32.xlu0 %v260_v21, %s897_s20  ;;  %366 = vrot.lane.b32.xlu1 %v260_v21, %s898_s21 }
 0x1e1   :  { %460 = vrot.lane.b32.xlu0 %v260_v21, %s895_s2  ;;  %554 = vrot.lane.b32.xlu1 %v260_v21, %s899_s22 }
 0x1e5   :  { %456 = vrot.lane.b32.xlu0 %v260_v21, %s900_s4  ;;  %550 = vrot.lane.b32.xlu1 %v260_v21, %s901_s23 }
 0x1e9   :  { %458 = vrot.lane.b32.xlu0 %v265_v19, %s900_s4  ;;  %552 = vrot.lane.b32.xlu1 %v265_v19, %s901_s23 }
 0x243   :  { %v463_v22 = vpop.permute.xlu1 %462  ;;  %v275_v23 = vpop.permute.xlu0 %274 }
 0x244   :  { %735 = vmatprep.subr.msk.mxu0 %vm276_vm1, %v275_v23 }
 0x245   :  { %736 = vmatpush3.xpose.msk.msra.mxu0 %vm276_vm1, %v275_v23 }
 0x247   :  { %v365_v24 = vpop.permute.xlu1 %364  ;;  %v369_v25 = vpop.permute.xlu0 %368 }
 0x248   :  { %742 = vmatprep.subr.msk.mxu1 %vm276_vm1, %v369_v25 }
 0x249   :  { %743 = vmatpush3.xpose.msk.msra.mxu1 %vm276_vm1, %v369_v25 }
 0x24b   :  { %v557_v26 = vpop.permute.xlu0 %556  ;;  %v273_v27 = vpop.permute.xlu1 %272 }
 0x24c   :  { %737 = vmatprep.subr.msk.mxu0 %vm276_vm1, %v273_v27 }
 0x24d   :  { %738 = vmatpush3.xpose.msk.msra.mxu0 %vm276_vm1, %v273_v27 }
 0x24e   :  { %749 = vmatprep.subr.msk.mxu0 %vm276_vm1, %v463_v22 }
 0x24f   :  { %v363_v28 = vpop.permute.xlu0 %362  ;;  %v367_v29 = vpop.permute.xlu1 %366 }
 0x250   :  { %740 = vmatmul.mubr.msk.f32.vlgmr.msra.gmra.mxu0 %vm276_vm1, %v265_v19  ;;  %744 = vmatprep.subr.msk.mxu1 %vm276_vm1, %v367_v29 }
 0x251   :  { %746 = vmatprep.mubr.msk.f32.mxu1 %vm276_vm1, %v363_v28  ;;  %745 = vmatpush3.xpose.msk.msra.mxu1 %vm276_vm1, %v367_v29 }
 0x252   :  { %750 = vmatpush3.xpose.msk.msra.mxu0 %vm276_vm1, %v463_v22  ;;  %756 = vmatprep.subr.msk.mxu1 %vm276_vm1, %v557_v26 }
 0x253   :  { %v461_v30 = vpop.permute.xlu0 %460  ;;  %v555_v31 = vpop.permute.xlu1 %554 }
 0x254   :  { %747 = vmatmul.mubr.msk.f32.vlgmr.msra.gmra.mxu1 %vm276_vm1, %v365_v24  ;;  %751 = vmatprep.subr.msk.mxu0 %vm276_vm1, %v461_v30 }
 0x255   :  { %757 = vmatpush3.xpose.msk.msra.mxu1 %vm276_vm1, %v557_v26 }
 0x256   :  { %752 = vmatpush3.xpose.msk.msra.mxu0 %vm276_vm1, %v461_v30  ;;  %758 = vmatprep.subr.msk.mxu1 %vm276_vm1, %v555_v31 }
 0x257   :  { %v457_v32 = vpop.permute.xlu0 %456  ;;  %v551_v33 = vpop.permute.xlu1 %550 }
 0x258   :  { %753 = vmatprep.mubr.msk.f32.mxu0 %vm276_vm1, %v457_v32  ;;  %760 = vmatprep.mubr.msk.f32.mxu1 %vm276_vm1, %v551_v33 }
 0x259   :  { %759 = vmatpush3.xpose.msk.msra.mxu1 %vm276_vm1, %v555_v31 }
 0x25b   :  { %v459_v34 = vpop.permute.xlu0 %458  ;;  %v553_v35 = vpop.permute.xlu1 %552 }
 0x25c   :  { %754 = vmatmul.mubr.msk.f32.vlgmr.msra.gmra.mxu0 %vm276_vm1, %v459_v34  ;;  %761 = vmatmul.mubr.msk.f32.vlgmr.msra.gmra.mxu1 %vm276_vm1, %v553_v35 }
 0x310   :  { %v741_v37 = vpop.f32.mrf.mxu0 }
 0x311   :  { %v357_v39 = vadd.f32 %v741_v37, %v269_v36 }
 0x312   :  { %v351_v40 = vpop.f32.mrf.mxu0 }
 0x313   :  { %361 = vst.msk [vmem:[#allocation10 + $0x8] sm:$0xff] %vm276_vm1, %v357_v39  ;;  %v352_v41 = vadd.f32 %v351_v40, %v268_v38 }
 0x314   :  { %v748_v42 = vpop.f32.mrf.mxu1 }
 0x315   :  { %360 = vst.msk [vmem:[#allocation10] sm:$0xff] %vm276_vm1, %v352_v41  ;;  %v450_v43 = vadd.f32 %v748_v42, %v269_v36 }
 0x316   :  { %v444_v44 = vpop.f32.mrf.mxu1 }
 0x317   :  { %455 = vst.msk [vmem:[#allocation10 + $0x18] sm:$0xff] %vm276_vm1, %v450_v43  ;;  %v445_v45 = vadd.f32 %v444_v44, %v268_v38 }
 0x319   :  { %454 = vst.msk [vmem:[#allocation10 + $0x10] sm:$0xff] %vm276_vm1, %v445_v45 }
 0x31c   :  { %v755_v46 = vpop.f32.mrf.mxu0  ;;  %v762_v47 = vpop.f32.mrf.mxu1 }
 0x31d   :  { %v544_v48 = vadd.f32 %v755_v46, %v269_v36  ;;  %v638_v49 = vadd.f32 %v762_v47, %v269_v36 }
 0x31e   :  { %v538_v50 = vpop.f32.mrf.mxu0  ;;  %v632_v51 = vpop.f32.mrf.mxu1 }
 0x31f   :  { %549 = vst.msk [vmem:[#allocation10 + $0x28] sm:$0xff] %vm276_vm1, %v544_v48  ;;  %643 = vst.msk [vmem:[#allocation10 + $0x38] sm:$0xff] %vm276_vm1, %v638_v49  ;;  %v539_v52 = vadd.f32 %v538_v50, %v268_v38  ;;  %v633_v53 = vadd.f32 %v632_v51, %v268_v38 }
 0x321   :  { %548 = vst.msk [vmem:[#allocation10 + $0x20] sm:$0xff] %vm276_vm1, %v539_v52  ;;  %642 = vst.msk [vmem:[#allocation10 + $0x30] sm:$0xff] %vm276_vm1, %v633_v53 }
 0x322   :  { %872 = shalt.err (!%p869_p10)
}
 0x323   :  { %655 = dma.vmem_to_hbm [thread:$0]  %s650_s25, 1024, %s1016_s6, [#allocation4], %s891_s26, %s891_s26, %s892_s27  }
 0x324   :  { %887 = dma.done.wait [#allocation4], 1024  }
 0x325   :  { %888 = vsyncadd [#allocation4], 4294966272 }
 0x326   :  { %659 = vsyncpa [#allocation3], 1 }
 0x327   :  { %660 = vsyncpa [#allocation6], 1 }
 0x328   :  { %661 = vsyncpa [#allocation9], 1 }
 0x329   :  { %662 = vsyncpa [#allocation4], 1 }

</bundles_post_ra>
